<compile_context>
chip_gen: v6e
topology: v6e:2x2x1
jax: 0.10.0
libtpu: 0.0.40
codegen_flags: <defaults>
</compile_context>

<pallas_src>
import jax
import jax.numpy as jnp
from jax import lax
from jax.experimental import pallas as pl
from jax.experimental.pallas import tpu as pltpu


# ---------------------------------------------------------------------------
# Tiling plan
# ---------------------------------------------------------------------------
_TARGET_BLOCK_BYTES = 4 << 20   # per X tile: 2-8 MiB keeps the HBM stream near roofline
_NUM_SPLITS = 2                 # leading "parallel" grid axis (v7x has 2 TensorCores)
_VMEM_CAP = 48 << 20            # safe on v7x (64 MiB physical) as well as v5e/v6e


def _round_up(x, m):
    return -(-x // m) * m


def _plan_tiles(c, hw, elt_bytes, ns=_NUM_SPLITS):
    """Return (tk, hw_pad, num_k) for grid (ns, num_k) over the HW axis."""
    tk_target = max(128, (_TARGET_BLOCK_BYTES // (c * elt_bytes)) // 128 * 128)
    if hw % (ns * 128) == 0:
        # No padding needed: largest 128-multiple <= target dividing each split.
        per_split = hw // ns
        tk = max(128, (min(tk_target, per_split) // 128) * 128)
        while per_split % tk != 0:
            tk -= 128
        return tk, hw, per_split // tk
    # Ragged HW: zero-pad (zeros contribute nothing to X X^T).
    per_split = _round_up(-(-hw // ns), 128)
    tk = min(tk_target, per_split)
    hw_pad = ns * tk * (-(-hw // (ns * tk)))
    return tk, hw_pad, hw_pad // (ns * tk)


# ---------------------------------------------------------------------------
# Kernel: unnormalized partial Gram sums, one [C, C] slab per HW split
# ---------------------------------------------------------------------------
def _partial_gram_kernel(x_ref, out_ref, acc_ref):
    k = pl.program_id(1)

    @pl.when(k == 0)
    def _():
        acc_ref[...] = jnp.zeros_like(acc_ref)

    x = x_ref[...]  # native / streaming dtype; MXU consumes bf16/f32 directly
    # Contract the lane (HW) dim of both operands: X @ X^T with no XLU
    # transpose of the [C, TK] tile.
    acc_ref[...] += lax.dot_general(
        x, x,
        dimension_numbers=(((1,), (1,)), ((), ())),
        preferred_element_type=jnp.float32,
    )

    @pl.when(k == pl.num_programs(1) - 1)
    def _():
        out_ref[0] = acc_ref[...]


def _partial_gram_sums(xm):
    """xm: [C, HW].  Returns unnormalized partial Grams [NS, C, C] (f32)."""
    c, hw = xm.shape
    elt = jnp.dtype(xm.dtype).itemsize
    ns = _NUM_SPLITS
    tk, hw_pad, num_k = _plan_tiles(c, hw, elt, ns)
    if hw_pad != hw:
        xm = jnp.pad(xm, ((0, 0), (0, hw_pad - hw)))

    # double-buffered X tile + double-buffered out block + f32 accumulator.
    x_block = c * tk * elt
    vmem = int(min(max(2 * x_block + 3 * c * c * 4 + (8 << 20), 16 << 20), _VMEM_CAP))

    return pl.pallas_call(
        _partial_gram_kernel,
        out_shape=jax.ShapeDtypeStruct((ns, c, c), jnp.float32),
        grid_spec=pltpu.PrefetchScalarGridSpec(
            num_scalar_prefetch=0,
            grid=(ns, num_k),
            in_specs=[pl.BlockSpec((c, tk), lambda g, k: (0, g * num_k + k))],
            out_specs=pl.BlockSpec((1, c, c), lambda g, k: (g, 0, 0)),
            scratch_shapes=[pltpu.VMEM((c, c), jnp.float32)],
        ),
        compiler_params=pltpu.CompilerParams(
            dimension_semantics=("parallel", "arbitrary"),
            vmem_limit_bytes=vmem,
        ),
        cost_estimate=pl.CostEstimate(
            flops=2 * c * c * hw_pad,
            transcendentals=0,
            bytes_accessed=c * hw_pad * elt + ns * c * c * 4,
        ),
    )(xm)


# ---------------------------------------------------------------------------
# Wrappers (jit'd end to end so pad/cast/epilogue fuse around the kernel)
# ---------------------------------------------------------------------------
def _as_feature_matrix(feature, stream_dtype):
    n, c, h, w = feature.shape
    assert n == 1, "StyleLoss assumes batch size 1 (torch view(c, h*w))"
    xm = feature.reshape(c, h * w)
    if stream_dtype is not None:
        xm = xm.astype(stream_dtype)
    return xm, c, h * w


def _gram_impl(feature, *, stream_dtype=None):
    xm, _, hw = _as_feature_matrix(feature, stream_dtype)
    parts = _partial_gram_sums(xm)
    return parts.sum(axis=0) * (1.0 / hw)          # matches torch: gram / (h*w)


def _style_loss_impl(x, style_gram, *, stream_dtype=None):
    xm, _, hw = _as_feature_matrix(x, stream_dtype)
    parts = _partial_gram_sums(xm)
    gram = parts.sum(axis=0) * (1.0 / hw)
    diff = gram - style_gram.astype(jnp.float32)
    return jnp.mean(diff * diff)                   # F.mse_loss


_gram_jit = jax.jit(_gram_impl, static_argnames=("stream_dtype",))
_style_loss_jit = jax.jit(_style_loss_impl, static_argnames=("stream_dtype",))


class StyleLoss:
    """JAX/Pallas port of the PyTorch StyleLoss module."""

    def __init__(self, style_feature, stream_dtype=None):
        self._stream_dtype = stream_dtype
        # .detach() equivalent: stop_gradient on the precomputed style gram.
        self.style_feature = jax.lax.stop_gradient(
            _gram_jit(style_feature, stream_dtype=stream_dtype))
        self.loss = None

    @staticmethod
    def gram_matrix(tensor):
        return _gram_jit(tensor)

    def __call__(self, x):
        self.loss = _style_loss_jit(x, self.style_feature,
                                    stream_dtype=self._stream_dtype)
        return x  # passthrough, exactly like the torch forward


def gram_matrix(feature):
    """feature: [1, C, H, W] -> gram [C, C] (matches StyleLoss.gram_matrix)."""
    return _gram_jit(feature)


# ---------------------------------------------------------------------------
# Pure-JAX reference for sanity checking
# ---------------------------------------------------------------------------
def _ref_loss(x, style_feature):
    def gram(t):
        _, c, h, w = t.shape
        m = t.reshape(c, h * w).astype(jnp.float32)
        return (m @ m.T) / (h * w)

    return jnp.mean((gram(x) - gram(style_feature)) ** 2)


if __name__ == "__main__":
    key = jax.random.PRNGKey(0)
    k1, k2, k3, k4 = jax.random.split(key, 4)

    # Case 1: HW divisible by 256 -> no padding, clean parallel+reduction grid.
    C, H, W = 8, 64, 64
    style_feat = jax.random.normal(k1, (1, C, H, W), dtype=jnp.float32)
    x = jax.random.normal(k2, (1, C, H, W), dtype=jnp.float32)

    module = StyleLoss(style_feat)
    out = jax.block_until_ready(module(x))
    loss = jax.block_until_ready(module.loss)

    ref = _ref_loss(x, style_feat)
    assert jnp.array_equal(out, x), "forward must return input unchanged"
    assert jnp.allclose(loss, ref, rtol=1e-5, atol=1e-5), (loss, ref)

    got_gram = jax.block_until_ready(StyleLoss.gram_matrix(x))
    ref_gram = (x.reshape(C, H * W) @ x.reshape(C, H * W).T) / (H * W)
    assert jnp.allclose(got_gram, ref_gram, rtol=1e-5, atol=1e-5)

    # Case 2: ragged HW (not a multiple of 128) exercises the zero-pad path.
    C2, H2, W2 = 4, 20, 20
    style_feat2 = jax.random.normal(k3, (1, C2, H2, W2), dtype=jnp.float32)
    x2 = jax.random.normal(k4, (1, C2, H2, W2), dtype=jnp.float32)
    module2 = StyleLoss(style_feat2)
    _ = jax.block_until_ready(module2(x2))
    loss2 = jax.block_until_ready(module2.loss)
    ref2 = _ref_loss(x2, style_feat2)
    assert jnp.allclose(loss2, ref2, rtol=1e-5, atol=1e-5), (loss2, ref2)

    # Case 3: optional bf16 streaming (halves HBM traffic, f32 accumulation);
    # compare against an f32 reference computed from bf16-rounded features.
    module3 = StyleLoss(style_feat, stream_dtype=jnp.bfloat16)
    _ = jax.block_until_ready(module3(x))
    loss3 = jax.block_until_ready(module3.loss)
    ref3 = _ref_loss(x.astype(jnp.bfloat16).astype(jnp.float32),
                     style_feat.astype(jnp.bfloat16).astype(jnp.float32))
    assert jnp.allclose(loss3, ref3, rtol=1e-3, atol=1e-5), (loss3, ref3)

    print("KERNEL_OK")
</pallas_src>

<mosaic_0001>
module attributes {stable_mosaic.version = 11 : i64} {
  func.func @_partial_gram_kernel(%arg0: i32, %arg1: i32, %arg2: memref<8x2048xf32, #tpu.memory_space<vmem>>, %arg3: memref<1x8x8xf32, #tpu.memory_space<vmem>>, %arg4: memref<8x8xf32, #tpu.memory_space<vmem>>) attributes {dimension_semantics = [#tpu.dimension_semantics<parallel>, #tpu.dimension_semantics<arbitrary>], iteration_bounds = array<i64: 2, 1>, scalar_prefetch = 0 : i64, scratch_operands = 1 : i64, tpu.core_type = #tpu.core_type<tc>, window_params = [{transform_indices = @transform_0, window_bounds = array<i64: 8, 2048>}, {transform_indices = @transform_1, window_bounds = array<i64: 1, 8, 8>}]} {
    %c0_i32 = arith.constant 0 : i32
    %0 = arith.cmpi eq, %arg1, %c0_i32 : i32
    %1 = arith.extui %0 : i1 to i32
    %c0_i32_0 = arith.constant 0 : i32
    %2 = arith.cmpi ne, %1, %c0_i32_0 : i32
    scf.if %2 {
      %cst_8 = arith.constant 0.000000e+00 : f32
      %11 = vector.broadcast %cst_8 : f32 to vector<8x8xf32>
      %c0_9 = arith.constant 0 : index
      %c0_10 = arith.constant 0 : index
      %12 = vector.load %arg4[%c0_9, %c0_10] : memref<8x8xf32, #tpu.memory_space<vmem>>, vector<8x8xf32>
      tpu.vector_store %arg4[%c0_9, %c0_10], %11 {strides = array<i32>} : memref<8x8xf32, #tpu.memory_space<vmem>>, vector<8x8xf32>,
    } else {
    }
    %c0 = arith.constant 0 : index
    %c0_1 = arith.constant 0 : index
    %3 = vector.load %arg2[%c0, %c0_1] : memref<8x2048xf32, #tpu.memory_space<vmem>>, vector<8x2048xf32>
    %c0_2 = arith.constant 0 : index
    %c0_3 = arith.constant 0 : index
    %4 = vector.load %arg4[%c0_2, %c0_3] : memref<8x8xf32, #tpu.memory_space<vmem>>, vector<8x8xf32>
    %cst = arith.constant dense<0.000000e+00> : vector<8x8xf32>
    %5 = tpu.matmul %3, %3, %cst {dimension_numbers = #tpu.dot_dimension_numbers<[1], [1], [0], [0], [0, 0, 1, 0], [], []>} : vector<8x2048xf32>, vector<8x2048xf32>, vector<8x8xf32> -> vector<8x8xf32>
    %6 = arith.addf %4, %5 : vector<8x8xf32>
    %c0_4 = arith.constant 0 : index
    %c0_5 = arith.constant 0 : index
    %7 = vector.load %arg4[%c0_4, %c0_5] : memref<8x8xf32, #tpu.memory_space<vmem>>, vector<8x8xf32>
    tpu.vector_store %arg4[%c0_4, %c0_5], %6 {strides = array<i32>} : memref<8x8xf32, #tpu.memory_space<vmem>>, vector<8x8xf32>,
    %c0_i32_6 = arith.constant 0 : i32
    %8 = arith.cmpi eq, %arg1, %c0_i32_6 : i32
    %9 = arith.extui %8 : i1 to i32
    %c0_i32_7 = arith.constant 0 : i32
    %10 = arith.cmpi ne, %9, %c0_i32_7 : i32
    scf.if %10 {
      %c0_8 = arith.constant 0 : index
      %c0_9 = arith.constant 0 : index
      %11 = vector.load %arg4[%c0_8, %c0_9] : memref<8x8xf32, #tpu.memory_space<vmem>>, vector<8x8xf32>
      %c0_10 = arith.constant 0 : index
      %c0_11 = arith.constant 0 : index
      %c0_12 = arith.constant 0 : index
      %12 = vector.load %arg3[%c0_10, %c0_11, %c0_12] : memref<1x8x8xf32, #tpu.memory_space<vmem>>, vector<1x8x8xf32>
      %13 = vector.shape_cast %12 : vector<1x8x8xf32> to vector<8x8xf32>
      %14 = vector.shape_cast %11 : vector<8x8xf32> to vector<1x8x8xf32>
      tpu.vector_store %arg3[%c0_10, %c0_11, %c0_12], %14 {strides = array<i32>} : memref<1x8x8xf32, #tpu.memory_space<vmem>>, vector<1x8x8xf32>,
    } else {
    }
    return
  }
  func.func @transform_0(%arg0: i32, %arg1: i32) -> (i32, i32) {
    %c1_i32 = arith.constant 1 : i32
    %0 = arith.muli %arg0, %c1_i32 : i32
    %1 = arith.addi %0, %arg1 : i32
    %c0_i32 = arith.constant 0 : i32
    %c0_i32_0 = arith.constant 0 : i32
    return %c0_i32, %1 : i32, i32
  }
  func.func @transform_1(%arg0: i32, %arg1: i32) -> (i32, i32, i32) {
    %c0_i32 = arith.constant 0 : i32
    %c0_i32_0 = arith.constant 0 : i32
    %c0_i32_1 = arith.constant 0 : i32
    return %arg0, %c0_i32, %c0_i32_0 : i32, i32, i32
  }
}

</mosaic_0001>

<bundles_post_ra>
// kernel: _gram_impl.1
= control target key start
LH: loop header
LB: loop body
LE: loop exit
PB: predicated region body
PF: predicated region fallthrough
CT: control target
= control target key end

     0   :  { %s858_s6 = smov 0   ;;  %s860_s7 = smov 0   ;;  %s917_s0 = inlined_call_operand.vmem [shape: f32[8,4096], index: 0, kind: input, shape index: {}]   ;;  %s918_s1 = inlined_call_operand.vmem [shape: f32[2,8,8], index: 1, kind: output, shape index: {}]  }
   0x1   :  { %s862_s8 = smov 0  }
   0x2 LB: > { %s23_s9 = sadd.s32 1, %s841_s7  ;;  %p792_p0 = scmp.ge.s32.totalorder %s845_s8, 1  ;;  %s845_s8 = sphi %s862_s8, %s11_s8   ;;  %s841_s7 = sphi %s860_s7, %s920_s7   ;;  %s837_s6 = sphi %s858_s6, %s919_s6  }
   0x3   : > { %p25_p1 = scmp.ge.s32.totalorder %s23_s9, 2  ;;  %p104_p2 = scmp.lt.s32.totalorder %s845_s8, 3 }
   0x5   : > { %s922_s9 = smov (%p25_p1, %s23_s9), 0  ;;  %p105_p3 = pnand %p792_p0, %p104_p2 }
   0x6   : > { %s793_s10 = sshll.u32 (!%p105_p3), %s837_s6, 4  ;;  %p132_p5 = scmp.lt.s32.totalorder (!%p105_p3), %s837_s6, 1 }
   0x7   : > { %108 = sbr.rel (%p105_p3) target bundleno = 240 (0xf0), region = 24  ;;  %p126_p4 = scmp.lt.s32.totalorder (!%p105_p3), %s793_s10, 31 }
   0xc   : > { %s924_s10 = smov (!%p126_p4, %s793_s10), 31  ;;  %vm140_vm0 = vcmask 64512   ;;  %v847_v16 = vmov 0.0   ;;  %s926_s6 = smov (!%p132_p5, %s837_s6), 1 }
   0xd   : > { %s794_s11 = sshll.u32 %s924_s10, 3  ;;  %141 = vst.msk [vmem:[#allocation2] sm:$0xff] %vm140_vm0, %v847_v16  ;;  %s795_s15 = sshll.u32 %s926_s6, 3 }
   0xe   : > { %s882_s14 = scalar_lea.vmem %s917_s0, %s794_s11  ;;  %s135_s18 = scalar_lea.vmem %s918_s1, %s795_s15 }
   0xf   : > { %v143_v0 = vld [vmem:[%s882_s14 + $0x8] sm:$0xff]  ;;  %v142_v1 = vld [vmem:[%s882_s14] sm:$0xff]  ;;  %v145_v2 = vld [vmem:[%s882_s14 + $0x18] sm:$0xff] }
  0x10   : > { %189 = vmatprep.subr.mxu0 %v143_v0  ;;  %259 = vmatprep.subr.mxu1 %v145_v2  ;;  %v144_v3 = vld [vmem:[%s882_s14 + $0x10] sm:$0xff]  ;;  %v147_v4 = vld [vmem:[%s882_s14 + $0x28] sm:$0xff]  ;;  %v149_v5 = vld [vmem:[%s882_s14 + $0x38] sm:$0xff] }
  0x11   : > { %190 = vmatpush1.xpose.msra.mxu0 %v142_v1  ;;  %260 = vmatpush1.xpose.msra.mxu1 %v144_v3  ;;  %v146_v6 = vld [vmem:[%s882_s14 + $0x20] sm:$0xff]  ;;  %v148_v7 = vld [vmem:[%s882_s14 + $0x30] sm:$0xff]  ;;  %v151_v8 = vld [vmem:[%s882_s14 + $0x48] sm:$0xff] }
  0x12   : > { %223 = vmatprep.mubr.f32.mxu0 %v143_v0  ;;  %293 = vmatprep.mubr.f32.mxu1 %v145_v2  ;;  %v153_v9 = vld [vmem:[%s882_s14 + $0x58] sm:$0xff]  ;;  %v150_v10 = vld [vmem:[%s882_s14 + $0x40] sm:$0xff]  ;;  %v152_v11 = vld [vmem:[%s882_s14 + $0x50] sm:$0xff] }
  0x13   : > { %329 = vmatprep.subr.mxu0 %v147_v4  ;;  %399 = vmatprep.subr.mxu1 %v149_v5  ;;  %v155_v12 = vld [vmem:[%s882_s14 + $0x68] sm:$0xff]  ;;  %v157_v13 = vld [vmem:[%s882_s14 + $0x78] sm:$0xff]  ;;  %v154_v14 = vld [vmem:[%s882_s14 + $0x60] sm:$0xff] }
  0x14   : > { %224 = vmatmul.mubr.f32.vlgmr.msra.gmra.mxu0 %v142_v1  ;;  %294 = vmatmul.mubr.f32.vlgmr.msra.gmra.mxu1 %v144_v3  ;;  %v156_v15 = vld [vmem:[%s882_s14 + $0x70] sm:$0xff]  ;;  %v158_v37 = vld [vmem:[#allocation2] sm:$0xff] }
  0x15   : > { %330 = vmatpush1.xpose.msra.mxu0 %v146_v6  ;;  %400 = vmatpush1.xpose.msra.mxu1 %v148_v7 }
  0x16   : > { %363 = vmatprep.mubr.f32.mxu0 %v147_v4  ;;  %433 = vmatprep.mubr.f32.mxu1 %v149_v5 }
  0x17   : > { %469 = vmatprep.subr.mxu0 %v151_v8  ;;  %539 = vmatprep.subr.mxu1 %v153_v9 }
  0x18   : > { %364 = vmatmul.mubr.f32.vlgmr.msra.gmra.mxu0 %v146_v6  ;;  %434 = vmatmul.mubr.f32.vlgmr.msra.gmra.mxu1 %v148_v7 }
  0x19   : > { %470 = vmatpush1.xpose.msra.mxu0 %v150_v10  ;;  %540 = vmatpush1.xpose.msra.mxu1 %v152_v11 }
  0x1a   : > { %503 = vmatprep.mubr.f32.mxu0 %v151_v8  ;;  %573 = vmatprep.mubr.f32.mxu1 %v153_v9 }
  0x1b   : > { %609 = vmatprep.subr.mxu0 %v155_v12  ;;  %679 = vmatprep.subr.mxu1 %v157_v13 }
  0x1c   : > { %504 = vmatmul.mubr.f32.vlgmr.msra.gmra.mxu0 %v150_v10  ;;  %574 = vmatmul.mubr.f32.vlgmr.msra.gmra.mxu1 %v152_v11 }
  0x1d   : > { %610 = vmatpush1.xpose.msra.mxu0 %v154_v14  ;;  %680 = vmatpush1.xpose.msra.mxu1 %v156_v15 }
  0x1e   : > { %643 = vmatprep.mubr.f32.mxu0 %v155_v12  ;;  %713 = vmatprep.mubr.f32.mxu1 %v157_v13 }
  0x20   : > { %644 = vmatmul.mubr.f32.vlgmr.msra.gmra.mxu0 %v154_v14  ;;  %714 = vmatmul.mubr.f32.vlgmr.msra.gmra.mxu1 %v156_v15 }
  0xd4   : > { %v225_v17 = vpop.f32.mrf.mxu0  ;;  %v295_v18 = vpop.f32.mrf.mxu1 }
  0xd5   : > { %v296_v21 = vadd.f32 %v295_v18, %v225_v17 }
  0xd6   : > { %v227_v19 = vpop.f32.mrf.mxu0  ;;  %v297_v20 = vpop.f32.mrf.mxu1 }
  0xd8   : > { %v365_v22 = vpop.f32.mrf.mxu0  ;;  %v435_v23 = vpop.f32.mrf.mxu1 }
  0xd9   : > { %v366_v24 = vadd.f32 %v365_v22, %v296_v21 }
  0xda   : > { %v367_v25 = vpop.f32.mrf.mxu0  ;;  %v437_v26 = vpop.f32.mrf.mxu1 }
  0xdb   : > { %v436_v27 = vadd.f32 %v435_v23, %v366_v24 }
  0xdc   : > { %v505_v28 = vpop.f32.mrf.mxu0  ;;  %v575_v29 = vpop.f32.mrf.mxu1 }
  0xdd   : > { %v506_v30 = vadd.f32 %v505_v28, %v436_v27 }
  0xde   : > { %v507_v31 = vpop.f32.mrf.mxu0  ;;  %v577_v32 = vpop.f32.mrf.mxu1 }
  0xdf   : > { %v576_v33 = vadd.f32 %v575_v29, %v506_v30 }
  0xe0   : > { %v645_v34 = vpop.f32.mrf.mxu0  ;;  %v715_v35 = vpop.f32.mrf.mxu1 }
  0xe1   : > { %v646_v36 = vadd.f32 %v645_v34, %v576_v33 }
  0xe2   : > { %v647_v38 = vpop.f32.mrf.mxu0  ;;  %v717_v39 = vpop.f32.mrf.mxu1 }
  0xe3   : > { %v716_v40 = vadd.f32 %v715_v35, %v646_v36 }
  0xe5   : > { %v719_v41 = vadd.f32 %v716_v40, %v158_v37 }
  0xe7   : > { %721 = vst.msk [vmem:[#allocation2] sm:$0xff] %vm140_vm0, %v719_v41 }
  0xee   : > { %v725_v42 = vld [vmem:[#allocation2] sm:$0xff] }
  0xef   : > { %726 = vst.msk [vmem:[%s135_s18] sm:$0xff] %vm140_vm0, %v725_v42 }
  0xf0 PF: > { %s11_s8 = sadd.s32 1, %s845_s8   ;;  %s919_s6 = smov %s841_s7 }
  0xf1   : > { %p8_p6 = scmp.ge.s32.totalorder %s11_s8, 4   ;;  %s920_s7 = smov %s922_s9 }
  0xf3   :  { %10 = sbr.rel (!%p8_p6) target bundleno = 2 (0x2), region = 62 }

</bundles_post_ra>
